<compile_context>
chip_gen: v5e
topology: v5e:2x2
jax: 0.10.0
libtpu: 0.0.40
codegen_flags: <defaults>
</compile_context>

<pallas_src>
import math

import jax
import jax.numpy as jnp
import numpy as np
from jax.experimental import pallas as pl
from jax.experimental.pallas import tpu as pltpu

_LANE = 128
_BLOCK_BYTES = 4 << 20            # target bytes per x block (perf review)
_VMEM_SOFT_CAP = 28 << 20         # cap on double-buffered working set


def _interp_matrix_np(L: int, n_out: int) -> np.ndarray:
    """(L, n_out) matrix W s.t. p @ W == F.interpolate(p, n_out, mode='linear',
    align_corners=False).  Built on host with static shapes (no gathers)."""
    scale = L / n_out
    j = np.arange(n_out, dtype=np.float32)
    src = np.maximum((j + 0.5) * scale - 0.5, 0.0)        # PyTorch clamps src < 0
    i0 = np.minimum(np.floor(src).astype(np.int64), L - 1)
    i1 = np.minimum(i0 + 1, L - 1)
    w1 = (src - i0.astype(np.float32)).astype(np.float32)
    w0 = (1.0 - w1).astype(np.float32)
    W = np.zeros((L, n_out), dtype=np.float32)
    cols = np.arange(n_out)
    W[i0, cols] += w0                                     # (i0[j], j) pairs unique
    W[i1, cols] += w1                                     # i0==i1 -> weights sum to 1
    return W


def _choose_fold(B: int, M: int, row_pack: int) -> int:
    """Fold factor k: x (B, M) -> (B*k, M//k) so rows fill the vreg sublanes
    when B is small.  Keeps M//k a multiple of 128 (lane-dense stores)."""
    if B >= row_pack or M % _LANE != 0:
        return 1
    units = M // _LANE                 # k must divide this
    needed = -(-row_pack // B)         # ceil(row_pack / B)
    best = 1
    for k in range(1, min(units, 64) + 1):
        if units % k == 0:
            if k >= needed:
                return k               # smallest divisor filling the sublanes
            best = k
    return best


def _select_tiles(R, Mk, dsize_x, dsize_o, pe_rows, row_pack):
    """Pick (TB, TL) for the folded (R, Mk) arrays and estimate VMEM need."""
    row_align = (row_pack * pe_rows) // math.gcd(row_pack, pe_rows)
    budget = max(_LANE * row_align, _BLOCK_BYTES // dsize_x)   # elems per block

    if R * Mk <= budget:
        TB, TL = R, Mk                                          # one block
    elif Mk * row_align <= budget:
        TB = min(R, max(row_align, (budget // Mk) // row_align * row_align))
        TL = Mk                                                 # full lane width
    else:
        TB = min(R, row_align)
        TL = min(Mk, max(_LANE, (budget // TB) // _LANE * _LANE))
        nl = pl.cdiv(Mk, TL)                                    # even lane blocks
        TL = min(Mk, pl.cdiv(pl.cdiv(Mk, nl), _LANE) * _LANE)

    # Megacore: keep >= 2 grid steps whenever there is real work to split.
    if pl.cdiv(R, TB) * pl.cdiv(Mk, TL) == 1 and R * Mk * dsize_x >= (2 << 20):
        if Mk >= 2 * _LANE:
            TL = pl.cdiv(pl.cdiv(Mk, 2), _LANE) * _LANE
        elif R >= 2 * row_align:
            TB = max(row_align, (R // 2) // row_align * row_align)

    def vmem_bytes(tb, tl):
        return 2 * tb * tl * (dsize_x + dsize_o) + 2 * pe_rows * tl * 4

    while vmem_bytes(TB, TL) > _VMEM_SOFT_CAP and TL > _LANE:
        TL = max(_LANE, pl.cdiv(TL // 2, _LANE) * _LANE)
    while vmem_bytes(TB, TL) > _VMEM_SOFT_CAP and TB > row_align:
        TB = max(row_align, (TB // 2) // row_align * row_align)

    return TB, TL, vmem_bytes(TB, TL)


def _add_pe_kernel(x_ref, pe_ref, o_ref):
    # x_ref: (TB, TL); pe_ref: (pe_rows, TL); o_ref: (TB, TL) in promoted dtype.
    pe = pe_ref[...]
    reps = x_ref.shape[0] // pe_ref.shape[0]
    if pe_ref.shape[0] > 1 and reps > 1:
        # global row g needs PE row g % k; blocks are k-aligned so this is a
        # simple sublane replication (cheap VPU/vld filler under mem-bound).
        pe = jnp.concatenate([pe] * reps, axis=0)
    o_ref[...] = (x_ref[...].astype(pe.dtype) + pe).astype(o_ref.dtype)


@jax.jit
def squeeze_axial_positional_embedding(x, pos_embed):
    """x: (B, C, N); pos_embed: (1, C, L) -> x + interp(pos_embed, N)."""
    B, C, N = x.shape
    _, C2, L = pos_embed.shape
    assert C == C2

    out_dtype = jnp.result_type(x.dtype, pos_embed.dtype)      # PyTorch promotion
    dsize_x = jnp.dtype(x.dtype).itemsize
    dsize_o = jnp.dtype(out_dtype).itemsize
    row_pack = max(8, 32 // max(1, dsize_x))                   # 8 f32 / 16 bf16 / 32 i8

    # --- batch-invariant interpolation, hoisted out of the grid loop --------
    W = jnp.asarray(_interp_matrix_np(L, N))                                 # (L, N) f32
    pe = jnp.dot(pos_embed[0].astype(jnp.float32), W,
                 precision=jax.lax.Precision.HIGHEST)                        # (C, N) f32

    M = C * N
    k = _choose_fold(B, M, row_pack)          # fold lanes->rows for small batch
    R, Mk = B * k, M // k
    x2 = x.reshape(B, M).reshape(R, Mk)       # contiguous, free
    pe2 = pe.reshape(1, M).reshape(k, Mk)     # same fold layout as x2

    TB, TL, vmem_need = _select_tiles(R, Mk, dsize_x, dsize_o, k, row_pack)
    grid = (pl.cdiv(Mk, TL), pl.cdiv(R, TB))  # rows innermost -> PE tile resident

    # TODO(synk): for B < 8 the PE HBM round trip adds ~1/(2B) extra bytes; it
    # could be fused in-kernel (interp once into VMEM scratch under pl.when)
    # if tiny-batch latency ever matters.
    out2 = pl.pallas_call(
        _add_pe_kernel,
        out_shape=jax.ShapeDtypeStruct((R, Mk), out_dtype),
        grid_spec=pltpu.PrefetchScalarGridSpec(
            num_scalar_prefetch=0,
            grid=grid,
            in_specs=[
                pl.BlockSpec((TB, TL), lambda j, i: (i, j)),     # x tile
                pl.BlockSpec((k, TL), lambda j, i: (0, j)),      # PE lane tile
            ],
            out_specs=pl.BlockSpec((TB, TL), lambda j, i: (i, j)),
        ),
        compiler_params=pltpu.CompilerParams(
            dimension_semantics=("parallel", "parallel"),
            vmem_limit_bytes=min(48 << 20, max(32 << 20, int(vmem_need * 5 // 4))),
        ),
        cost_estimate=pl.CostEstimate(
            flops=B * M,
            transcendentals=0,
            bytes_accessed=B * M * (dsize_x + dsize_o) + M * 4,
        ),
    )(x2, pe2)

    return out2.reshape(B, C, N)


def _reference(x, pos_embed):
    """Pure-JAX reference of F.interpolate(linear, align_corners=False) + add."""
    B, C, N = x.shape
    _, _, L = pos_embed.shape
    scale = L / N
    j = jnp.arange(N, dtype=jnp.float32)
    src = jnp.maximum((j + 0.5) * scale - 0.5, 0.0)
    i0 = jnp.minimum(jnp.floor(src).astype(jnp.int32), L - 1)
    i1 = jnp.minimum(i0 + 1, L - 1)
    w1 = src - i0.astype(jnp.float32)
    w0 = 1.0 - w1
    p = pos_embed[0]                                             # (C, L)
    interp = p[:, i0] * w0[None, :] + p[:, i1] * w1[None, :]     # (C, N)
    return x + interp[None, :, :]


if __name__ == "__main__":
    key = jax.random.PRNGKey(0)

    # Primary shape: small batch exercises the lane->row fold (k=4, R=8).
    cases = [
        (2, 32, 16, 8),    # B, C, N, L   (M=512, fold k=4)
        (2, 48, 20, 8),    # M=960 not a 128-multiple -> no fold, full-extent tiles
        (9, 16, 16, 8),    # B >= 8 -> (1, TL) PE broadcast path
    ]

    ok = True
    for idx, (B, C, N, L) in enumerate(cases):
        k1, k2 = jax.random.split(jax.random.fold_in(key, idx))
        x = jax.random.normal(k1, (B, C, N), dtype=jnp.float32)
        # Module inits pos_embed to zeros; use random values so the
        # interpolation path is actually exercised.
        pos_embed = 0.1 * jax.random.normal(k2, (1, C, L), dtype=jnp.float32)

        out = jax.block_until_ready(squeeze_axial_positional_embedding(x, pos_embed))
        ref = _reference(x, pos_embed)

        assert out.shape == (B, C, N)
        err = float(jnp.max(jnp.abs(out - ref)))
        if not jnp.allclose(out, ref, atol=1e-5, rtol=1e-5):
            ok = False
            print(f"case {idx} mismatch, max abs err = {err}")

    if ok:
        print("KERNEL_OK")
</pallas_src>

<mosaic_0001>
module attributes {stable_mosaic.version = 11 : i64} {
  func.func @_add_pe_kernel(%arg0: i32, %arg1: i32, %arg2: memref<8x128xf32, #tpu.memory_space<vmem>>, %arg3: memref<4x128xf32, #tpu.memory_space<vmem>>, %arg4: memref<8x128xf32, #tpu.memory_space<vmem>>) attributes {dimension_semantics = [#tpu.dimension_semantics<parallel>, #tpu.dimension_semantics<parallel>], iteration_bounds = array<i64: 1, 1>, scalar_prefetch = 0 : i64, scratch_operands = 0 : i64, tpu.core_type = #tpu.core_type<tc>, window_params = [{transform_indices = @transform_0, window_bounds = array<i64: 8, 128>}, {transform_indices = @transform_1, window_bounds = array<i64: 4, 128>}, {transform_indices = @transform_2, window_bounds = array<i64: 8, 128>}]} {
    %c0 = arith.constant 0 : index
    %c0_0 = arith.constant 0 : index
    %0 = vector.load %arg3[%c0, %c0_0] : memref<4x128xf32, #tpu.memory_space<vmem>>, vector<4x128xf32>
    %1 = tpu.concatenate %0, %0 in 0 : vector<4x128xf32>, vector<4x128xf32> -> vector<8x128xf32>
    %c0_1 = arith.constant 0 : index
    %c0_2 = arith.constant 0 : index
    %2 = vector.load %arg2[%c0_1, %c0_2] : memref<8x128xf32, #tpu.memory_space<vmem>>, vector<8x128xf32>
    %3 = arith.addf %2, %1 : vector<8x128xf32>
    %c0_3 = arith.constant 0 : index
    %c0_4 = arith.constant 0 : index
    %4 = vector.load %arg4[%c0_3, %c0_4] : memref<8x128xf32, #tpu.memory_space<vmem>>, vector<8x128xf32>
    tpu.vector_store %arg4[%c0_3, %c0_4], %3 {strides = array<i32>} : memref<8x128xf32, #tpu.memory_space<vmem>>, vector<8x128xf32>,
    return
  }
  func.func @transform_0(%arg0: i32, %arg1: i32) -> (i32, i32) {
    %c0_i32 = arith.constant 0 : i32
    return %arg1, %arg0 : i32, i32
  }
  func.func @transform_1(%arg0: i32, %arg1: i32) -> (i32, i32) {
    %c0_i32 = arith.constant 0 : i32
    %c0_i32_0 = arith.constant 0 : i32
    return %c0_i32, %arg0 : i32, i32
  }
  func.func @transform_2(%arg0: i32, %arg1: i32) -> (i32, i32) {
    %c0_i32 = arith.constant 0 : i32
    return %arg1, %arg0 : i32, i32
  }
}

</mosaic_0001>

<bundles_post_ra>
// kernel: squeeze_axial_positional_embedding.1
= control target key start
LH: loop header
LB: loop body
LE: loop exit
PB: predicated region body
PF: predicated region fallthrough
CT: control target
= control target key end

     0   :  { %vm15_vm0 = vcmask 1043456   ;;  %s48_s0 = inlined_call_operand.vmem [shape: f32[8,128], index: 0, kind: input, shape index: {}]   ;;  %s49_s1 = inlined_call_operand.vmem [shape: f32[4,128], index: 1, kind: input, shape index: {}]   ;;  %s50_s2 = inlined_call_operand.vmem [shape: f32[8,128], index: 2, kind: output, shape index: {}]  }
   0x1   :  { %v11_v0 = vld [vmem:[%s49_s1] sm:$0xf] }
   0x2   :  { %v13_v1 = vrot.slane %v11_v0, 4  ;;  %v17_v2 = vld [vmem:[%s48_s0] sm:$0xff] }
   0x4   :  { %v16_v3 = vsel %vm15_vm0, %v11_v0, %v13_v1 }
   0x5   :  { %v18_v4 = vadd.f32 %v17_v2, %v16_v3 }
   0x7   :  { %19 = vst [vmem:[%s50_s2] sm:$0xff] %v18_v4 }

</bundles_post_ra>
